<compile_context>
chip_gen: v6e
topology: v6e:2x2x1
jax: 0.10.0
libtpu: 0.0.40
codegen_flags: <defaults>
</compile_context>

<pallas_src>
import functools

import jax
import jax.numpy as jnp
from jax.experimental import pallas as pl
from jax.experimental.pallas import tpu as pltpu


def _gp_kernel(g_ref, out_ref, *, inv_hw, inv_w, in_channels, num_channels):
    # g_ref: (TN, C, H*W) block in VMEM, input dtype.
    g = g_ref[...]

    # Spatial reductions over the lane-dense H*W axis.
    #  - mean: f32-accumulated sum (no full-tile up-cast of the input block)
    #  - max : reduced in the input dtype, only the (TN, C) result is cast
    mean = jnp.sum(g, axis=-1, dtype=jnp.float32) * inv_hw        # (TN, C) f32
    mx = jnp.max(g, axis=-1).astype(jnp.float32)                  # (TN, C) f32

    # torch.cat((mean, mean * 1/W, max), dim=1) flattened to (TN, 3C).
    flat = jnp.concatenate([mean, mean * inv_w, mx], axis=-1)     # (TN, 3C) f32

    # Fused tail: .view(N, num_channels, -1).mean(dim=2)  ==  flat @ sel,
    # where sel is a static (3C, num_channels) matrix: output channel c averages the
    # `group` consecutive entries of the concatenated vector (this reproduces the
    # channel-interleaving semantics of the original torch .view exactly).
    total = 3 * in_channels
    group = total // num_channels
    j = jax.lax.broadcasted_iota(jnp.int32, (total, num_channels), 0)
    c = jax.lax.broadcasted_iota(jnp.int32, (total, num_channels), 1)
    sel = jnp.where((j >= group * c) & (j < group * (c + 1)),
                    jnp.float32(1.0 / group), jnp.float32(0.0))   # (3C, num_channels)

    out = jnp.dot(flat, sel, preferred_element_type=jnp.float32)  # (TN, num_channels)
    out_ref[...] = out.astype(out_ref.dtype)


def _choose_tile_n(N, row_bytes, target_bytes=4 << 20):
    """Pick a batch tile so one input block is ~target_bytes (double-buffered -> 2x)."""
    tn = max(1, target_bytes // max(1, row_bytes))
    if tn >= N:
        return N  # full batch fits: block dim == full array dim satisfies tiling rules
    # Output block's second-to-last dim must be a multiple of 8 (or the full dim).
    tn = max(8, (tn // 8) * 8)
    return min(tn, N)
    # TODO(synk): for pathologically large C*H*W rows (>~1M elems) a C-axis grid would
    # also be needed to keep blocks inside v7x VMEM; not required for this model's shapes.


def global_pooling_layer(G, num_channels, board_width):
    """Forward pass of GlobalPoolingLayer.  G: (N, C, H, W) float array."""
    N, C, H, W = G.shape
    HW = H * W

    # Free, contiguous reshape: put the full spatial extent on the 128-lane axis.
    Gf = G.reshape(N, C, HW)

    itemsize = jnp.dtype(G.dtype).itemsize
    TN = _choose_tile_n(N, C * HW * itemsize)
    grid = (pl.cdiv(N, TN),)

    kernel = functools.partial(
        _gp_kernel,
        inv_hw=1.0 / HW,
        inv_w=1.0 / board_width,
        in_channels=C,
        num_channels=num_channels,
    )

    out = pl.pallas_call(
        kernel,
        grid=grid,
        in_specs=[pl.BlockSpec((TN, C, HW), lambda i: (i, 0, 0))],
        out_specs=pl.BlockSpec((TN, num_channels), lambda i: (i, 0)),
        out_shape=jax.ShapeDtypeStruct((N, num_channels), G.dtype),
        compiler_params=pltpu.CompilerParams(
            dimension_semantics=("parallel",),  # batch axis: megacore-shardable on v7x
        ),
    )(Gf)
    return out


def _reference(G, num_channels, board_width):
    mean = jnp.mean(G, axis=(2, 3), keepdims=True)
    mean_scaled = mean * (1.0 / board_width)
    mx = jnp.max(G, axis=2, keepdims=True)
    mx = jnp.max(mx, axis=3, keepdims=True)
    gf = jnp.concatenate([mean, mean_scaled, mx], axis=1)     # (N, 3C, 1, 1)
    return gf.reshape(gf.shape[0], num_channels, -1).mean(axis=2)


if __name__ == "__main__":
    key = jax.random.PRNGKey(0)
    N, C, H, W = 2, 4, 16, 16
    board_width = W  # board is W x W, matching the module's conventions

    G = jax.random.normal(key, (N, C, H, W), dtype=jnp.float32)

    out = global_pooling_layer(G, num_channels=C, board_width=board_width)
    out = jax.block_until_ready(out)

    ref = _reference(G, num_channels=C, board_width=board_width)
    assert out.shape == (N, C), out.shape
    assert jnp.allclose(out, ref, atol=1e-5, rtol=1e-5), (out, ref)

    print("KERNEL_OK")
</pallas_src>

<mosaic_0001>
module attributes {stable_mosaic.version = 11 : i64} {
  func.func @_gp_kernel(%arg0: i32, %arg1: memref<2x4x256xf32, #tpu.memory_space<vmem>>, %arg2: memref<2x4xf32, #tpu.memory_space<vmem>>) attributes {dimension_semantics = [#tpu.dimension_semantics<parallel>], iteration_bounds = array<i64: 1>, scalar_prefetch = 0 : i64, scratch_operands = 0 : i64, tpu.core_type = #tpu.core_type<tc>, window_params = [{transform_indices = @transform_0, window_bounds = array<i64: 2, 4, 256>}, {transform_indices = @transform_1, window_bounds = array<i64: 2, 4>}]} {
    %c0 = arith.constant 0 : index
    %c0_0 = arith.constant 0 : index
    %c0_1 = arith.constant 0 : index
    %0 = vector.load %arg1[%c0, %c0_0, %c0_1] : memref<2x4x256xf32, #tpu.memory_space<vmem>>, vector<2x4x256xf32>
    %cst = arith.constant dense<0.000000e+00> : vector<2x4xf32>
    %1 = vector.multi_reduction <add>, %0, %cst [2] : vector<2x4x256xf32> to vector<2x4xf32>
    %cst_2 = arith.constant 3.906250e-03 : f32
    %2 = vector.broadcast %cst_2 : f32 to vector<2x4xf32>
    %3 = arith.mulf %1, %2 : vector<2x4xf32>
    %cst_3 = arith.constant dense<0xFF800000> : vector<2x4xf32>
    %4 = vector.multi_reduction <maximumf>, %0, %cst_3 [2] : vector<2x4x256xf32> to vector<2x4xf32>
    %cst_4 = arith.constant 6.250000e-02 : f32
    %5 = vector.broadcast %cst_4 : f32 to vector<2x4xf32>
    %6 = arith.mulf %3, %5 : vector<2x4xf32>
    %7 = tpu.concatenate %3, %6, %4 in 1 : vector<2x4xf32>, vector<2x4xf32>, vector<2x4xf32> -> vector<2x12xf32>
    %8 = tpu.iota {dimensions = array<i32: 0>} : vector<12x4xi32>
    %9 = tpu.iota {dimensions = array<i32: 1>} : vector<12x4xi32>
    %c3_i32 = arith.constant 3 : i32
    %10 = vector.broadcast %c3_i32 : i32 to vector<12x4xi32>
    %11 = arith.muli %10, %9 : vector<12x4xi32>
    %12 = arith.cmpi sge, %8, %11 : vector<12x4xi32>
    %c1_i32 = arith.constant 1 : i32
    %13 = vector.broadcast %c1_i32 : i32 to vector<12x4xi32>
    %14 = arith.addi %9, %13 : vector<12x4xi32>
    %c3_i32_5 = arith.constant 3 : i32
    %15 = vector.broadcast %c3_i32_5 : i32 to vector<12x4xi32>
    %16 = arith.muli %15, %14 : vector<12x4xi32>
    %17 = arith.cmpi slt, %8, %16 : vector<12x4xi32>
    %18 = arith.andi %12, %17 : vector<12x4xi1>
    %cst_6 = arith.constant 0.333333343 : f32
    %cst_7 = arith.constant 0.000000e+00 : f32
    %19 = vector.broadcast %cst_6 : f32 to vector<12x4xf32>
    %20 = vector.broadcast %cst_7 : f32 to vector<12x4xf32>
    %21 = arith.select %18, %19, %20 : vector<12x4xi1>, vector<12x4xf32>
    %cst_8 = arith.constant dense<0.000000e+00> : vector<2x4xf32>
    %22 = tpu.matmul %7, %21, %cst_8 {dimension_numbers = #tpu.dot_dimension_numbers<[1], [0], [0], [1], [0, 0, 1, 1], [], []>} : vector<2x12xf32>, vector<12x4xf32>, vector<2x4xf32> -> vector<2x4xf32>
    %c0_9 = arith.constant 0 : index
    %c0_10 = arith.constant 0 : index
    %23 = vector.load %arg2[%c0_9, %c0_10] : memref<2x4xf32, #tpu.memory_space<vmem>>, vector<2x4xf32>
    tpu.vector_store %arg2[%c0_9, %c0_10], %22 {strides = array<i32>} : memref<2x4xf32, #tpu.memory_space<vmem>>, vector<2x4xf32>,
    return
  }
  func.func @transform_0(%arg0: i32) -> (i32, i32, i32) {
    %c0_i32 = arith.constant 0 : i32
    %c0_i32_0 = arith.constant 0 : i32
    %c0_i32_1 = arith.constant 0 : i32
    return %arg0, %c0_i32, %c0_i32_0 : i32, i32, i32
  }
  func.func @transform_1(%arg0: i32) -> (i32, i32) {
    %c0_i32 = arith.constant 0 : i32
    %c0_i32_0 = arith.constant 0 : i32
    return %arg0, %c0_i32 : i32, i32
  }
}

</mosaic_0001>

<bundles_post_ra>
// kernel: tpu_custom_call.1
= control target key start
LH: loop header
LB: loop body
LE: loop exit
PB: predicated region body
PF: predicated region fallthrough
CT: control target
= control target key end

     0   :  { %6 = vsyncpa [#allocation3], 0  ;;  %s311_s0 = inlined_call_operand.hbm [shape: f32[2,4,256], index: 0, kind: input, shape index: {}]   ;;  %s312_s1 = inlined_call_operand.hbm [shape: f32[2,4], index: 1, kind: output, shape index: {}]  }
   0x1   :  { %7 = vsyncpa [#allocation4], 0  ;;  %s275_s6 = smov [#allocation2]  }
   0x2   :  { %s13_s7 = sshll.u32 %s275_s6, 4  ;;  %s14_s7 = int_to_ptr.vmem [resolvable:$true] %s13_s7 }
   0x3   :  { %s239_s8 = scalar_lea.vmem %s14_s7, 256  ;;  %p244_p1 = scmp.lt.s32.totalorder %s14_s7, %s14_s7 }
   0x4   :  { %p240_p0 = scmp.ne.s32.totalorder %s14_s7, %s239_s8  ;;  %p245_p2 = scmp.lt.s32.totalorder %s239_s8, %s239_s8 }
   0x6   :  { %p246_p3 = por %p245_p2, %p244_p1 }
   0x8   :  { %p247_p4 = pnand %p246_p3, %p240_p0 }
   0xa   :  { %250 = shalt.err (!%p247_p4)
}
   0xb   :  { %s276_s9 = smov 128   ;;  %s277_s10 = smov 8  }
   0xc   :  { %19 = dma.hbm_to_vmem [thread:$0]  %s311_s0, 256, %s14_s7, [#allocation3], %s276_s9, %s276_s9, %s277_s10  }
   0xd   :  { %271 = dma.done.wait [#allocation3], 256  }
   0xe   :  { %272 = vsyncadd [#allocation3], 4294967040  ;;  %v58_v0 = vlaneseq  ;;  %vm31_vm0 = vcmask 1043456   ;;  %v23_v6 = vld [vmem:[#allocation2] sm:$0xff]  ;;  %v24_v7 = vld [vmem:[#allocation2 + $0x8] sm:$0xff]  ;;  %v278_v28 = vmov 0.0  }
   0xf   :  { %v27_v8 = vcombine.high %v23_v6, %v23_v6  ;;  %v32_v9 = vsel %vm31_vm0, %v23_v6, 0.0  ;;  %v44_v10 = vsel %vm31_vm0, %v23_v6, -inf  ;;  %v28_v11 = vcombine.high %v24_v7, %v24_v7  ;;  %215 = vmatprep.subr.mxu0 %v278_v28  ;;  %s281_s0 = smov [#allocation5]  }
  0x10   :  { %v59_v1 = vand.u32 127, %v58_v0  ;;  %v61_v2 = vshrl.u32 %v58_v0, 7  ;;  %v37_v12 = vsel %vm31_vm0, %v24_v7, 0.0  ;;  %v49_v13 = vsel %vm31_vm0, %v24_v7, -inf  ;;  %s200_s13 = sshll.u32 %s281_s0, 4  ;;  %s201_s13 = int_to_ptr.vmem [resolvable:$true] %s200_s13 }
  0x11   :  { %v33_v14 = vsel %vm31_vm0, %v27_v8, 0.0  ;;  %v45_v15 = vsel %vm31_vm0, %v27_v8, -inf  ;;  %v38_v16 = vsel %vm31_vm0, %v28_v11, 0.0  ;;  %v50_v17 = vsel %vm31_vm0, %v28_v11, -inf  ;;  %s251_s14 = scalar_lea.vmem %s201_s13, 32  ;;  %p256_p6 = scmp.lt.s32.totalorder %s201_s13, %s201_s13 }
  0x12   :  { %v295_v3 = vsub.s32 %v59_v1, %v61_v2  ;;  %v73_v4 = vadd.s32 4294967292, %v59_v1  ;;  %v34_v18 = vadd.f32 %v33_v14, %v32_v9  ;;  %v46_v19 = vmax.f32 %v44_v10, %v45_v15  ;;  %p252_p5 = scmp.ne.s32.totalorder %s201_s13, %s251_s14  ;;  %p257_p7 = scmp.lt.s32.totalorder %s251_s14, %s251_s14 }
  0x13   :  { %v39_v20 = vadd.f32 %v38_v16, %v37_v12  ;;  %v51_v21 = vmax.f32 %v49_v13, %v50_v17  ;;  %v86_v22 = vadd.s32 4294967288, %v59_v1  ;;  %v107_v24 = vadd.s32 1, %v59_v1 }
  0x14   :  { %v76_v5 = vsub.s32 %v73_v4, %v61_v2  ;;  %35 = vadd.xlane.f32.xlu0 %v34_v18  ;;  %47 = vmax.xlane.f32.xlu1 %v46_v19  ;;  %v103_v25 = vadd.s32 8, %v61_v2  ;;  %v104_v26 = vmul.u32 3, %v59_v1  ;;  %vm279_vm7 = vmmov 0   ;;  %p258_p8 = por %p257_p7, %p256_p6 }
  0x15   :  { %v89_v23 = vsub.s32 %v86_v22, %v61_v2  ;;  %v108_v27 = vmul.u32 3, %v107_v24  ;;  %219 = vmatprep.mubr.msk.f32.mxu0 %vm279_vm7, %v278_v28  ;;  %v280_v30 = vmov 0.33333334   ;;  %vm68_vm8 = vcmask 1041409  }
  0x16   :  { %vm106_vm1 = vcmp.ge.s32.totalorder %v103_v25, %v104_v26  ;;  %vm105_vm4 = vcmp.ge.s32.totalorder %v61_v2, %v104_v26  ;;  %vm97_vm9 = vcmask 31744   ;;  %vm99_vm10 = vcmask 64512   ;;  %p259_p9 = pnand %p258_p8, %p252_p5 }
  0x17   :  { %vm110_vm2 = vcmp.lt.s32.totalorder %v103_v25, %v108_v27  ;;  %vm109_vm5 = vcmp.lt.s32.totalorder %v61_v2, %v108_v27  ;;  %vm115_vm11 = vcmask 97280   ;;  %vm192_vm12 = vcmask 25600  }
  0x18   :  { %40 = vadd.xlane.f32.xlu0 %v39_v20  ;;  %52 = vmax.xlane.f32.xlu1 %v51_v21  ;;  %vm112_vm3 = vmand %vm106_vm1, %vm110_vm2 }
  0x19   :  { %v114_v29 = vsel %vm112_vm3, 0.33333334, %v278_v28  ;;  %vm111_vm6 = vmand %vm105_vm4, %vm109_vm5 }
  0x1a   :  { %216 = vmatpush3.msk.msra.mxu0 %vm31_vm0, %v114_v29 }
  0x1b   :  { %217 = vmatprep.subr.mxu0 %v278_v28 }
  0x1c   :  { %218 = vmatpush3.msk.msra.mxu0 %vm111_vm6, %v280_v30 }
  0x9d   :  { %v36_v31 = vpop.xlane.xlu0 %35  ;;  %v48_v32 = vpop.xlane.xlu1 %47 }
  0x9e   :  { %v42_v33 = vmul.f32 0.00390625, %v36_v31  ;;  %v90_v40 = vrot.slane %v48_v32, %v89_v23 }
  0xa0   :  { %v54_v35 = vmul.f32 0.0625, %v42_v33  ;;  %v63_v42 = vrot.slane %v42_v33, %v295_v3 }
  0xa1   :  { %v41_v34 = vpop.xlane.xlu0 %40  ;;  %v53_v37 = vpop.xlane.xlu1 %52 }
  0xa2   :  { %v43_v36 = vmul.f32 0.00390625, %v41_v34  ;;  %v94_v41 = vrot.slane %v53_v37, %v89_v23  ;;  %v77_v43 = vrot.slane %v54_v35, %v76_v5 }
  0xa4   :  { %v55_v38 = vmul.f32 0.0625, %v43_v36  ;;  %v67_v39 = vrot.slane %v43_v36, %v295_v3  ;;  %v95_v47 = vsel %vm68_vm8, %v94_v41, %v90_v40 }
  0xa6   :  { %v81_v44 = vrot.slane %v55_v38, %v76_v5  ;;  %v69_v45 = vsel %vm68_vm8, %v67_v39, %v63_v42 }
  0xa8   :  { %v82_v46 = vsel %vm68_vm8, %v81_v44, %v77_v43 }
  0xa9   :  { %v98_v48 = vsel %vm97_vm9, %v69_v45, %v82_v46 }
  0xaa   :  { %v100_v49 = vsel %vm99_vm10, %v98_v48, %v95_v47 }
  0xab   :  { %220 = vmatmul.mubr.msk.f32.vlgmr.msra.gmra.mxu0 %vm115_vm11, %v100_v49 }
 0x16b   :  { %v188_v50 = vpop.f32.mrf.mxu0 }
 0x16c   :  { %193 = vst.msk [vmem:[#allocation5] sm:$0x3] %vm192_vm12, %v188_v50 }
 0x16d   :  { %v221_v51 = vpop.f32.mrf.mxu0 }
 0x16e   :  { %262 = shalt.err (!%p259_p9)
}
 0x16f   :  { %203 = dma.vmem_to_hbm [thread:$0]  %s201_s13, 32, %s312_s1, [#allocation4]  }
 0x170   :  { %273 = dma.done.wait [#allocation4], 32  }
 0x171   :  { %274 = vsyncadd [#allocation4], 4294967264 }
 0x172   :  { %207 = vsyncpa [#allocation3], 1 }
 0x173   :  { %208 = vsyncpa [#allocation4], 1 }

</bundles_post_ra>
